<compile_context>
chip_gen: v7x
topology: tpu7x:2x2x1
jax: 0.10.0
libtpu: 0.0.40
codegen_flags: <defaults>
</compile_context>

<pallas_src>
import math

import jax
import jax.numpy as jnp
from jax.experimental import pallas as pl
from jax.experimental.pallas import tpu as pltpu


def _preproc_kernel(ids_ref, emb_ref, pos_ref, out_emb_ref, out_mask_ref):
    """Fused: scale, add positional embedding, mask by (ids != 0).

    ids_ref     : (TB, TN)    int32
    emb_ref     : (TB, TN, D) float32
    pos_ref     : (TN, D)     float32   (resident across batch tiles)
    out_emb_ref : (TB, TN, D) float32
    out_mask_ref: (TB, TN)    float32   (lane-dense; expanded in wrapper)
    """
    D = emb_ref.shape[-1]
    scale = jnp.float32(math.sqrt(float(D)))

    valid = (ids_ref[...] != 0).astype(jnp.float32)          # (TB, TN)
    user = emb_ref[...] * scale + pos_ref[...][None, :, :]    # (TB, TN, D)

    out_emb_ref[...] = user * valid[:, :, None]
    out_mask_ref[...] = valid


def _choose_tiles(B, N, D, itemsize=4, tile_budget_bytes=4 * 1024 * 1024):
    """Pick (TB, TN) that divide (B, N), satisfy the (8,128) block constraint,
    and keep the dominant (TB, TN, D) tile within ~4 MiB (fits double-buffered
    in the default scoped VMEM limit on all generations, incl. v7x)."""
    # batch tile: 8 if it divides B, otherwise the full batch
    if B <= 8 or B % 8 != 0:
        TB = B
    else:
        TB = 8

    # sequence tile: multiple of 128 dividing N, capped by the VMEM budget;
    # fall back to full N (always legal) for small / awkward N.
    if N <= 128:
        TN = N
    else:
        max_tn = max(128, tile_budget_bytes // max(1, TB * D * itemsize))
        max_tn = (max_tn // 128) * 128
        max_tn = min(max_tn, (N // 128) * 128)
        TN = None
        t = max_tn
        while t >= 128:
            if N % t == 0:
                TN = t
                break
            t -= 128
        if TN is None:
            TN = N
    return TB, TN


def learnable_pos_emb_preprocess(past_lengths, past_ids, past_embeddings, pos_emb_weight):
    """JAX wrapper mirroring the PyTorch forward (eval mode, dropout = id)."""
    B, N = past_ids.shape
    D = past_embeddings.shape[-1]
    # first N rows of the positional table == pos_emb(arange(N));
    # assumes N <= max_sequence_len (same contract as the PyTorch module).
    pos_slice = pos_emb_weight[:N, :].astype(jnp.float32)
    ids = past_ids.astype(jnp.int32)
    emb = past_embeddings.astype(jnp.float32)

    TB, TN = _choose_tiles(B, N, D)
    # sequence tiles outer, batch tiles inner -> pos tile stays VMEM-resident
    grid = (N // TN, B // TB)

    out_emb, out_mask = pl.pallas_call(
        _preproc_kernel,
        out_shape=(
            jax.ShapeDtypeStruct((B, N, D), jnp.float32),
            jax.ShapeDtypeStruct((B, N), jnp.float32),
        ),
        grid=grid,
        in_specs=[
            pl.BlockSpec((TB, TN), lambda j, i: (i, j)),        # past_ids
            pl.BlockSpec((TB, TN, D), lambda j, i: (i, j, 0)),  # past_embeddings
            pl.BlockSpec((TN, D), lambda j, i: (j, 0)),         # pos emb (batch-invariant)
        ],
        out_specs=(
            pl.BlockSpec((TB, TN, D), lambda j, i: (i, j, 0)),  # user_embeddings
            pl.BlockSpec((TB, TN), lambda j, i: (i, j)),        # valid_mask (lane-dense)
        ),
        compiler_params=pltpu.CompilerParams(
            dimension_semantics=("parallel", "parallel"),
        ),
    )(ids, emb, pos_slice)

    valid_mask = out_mask[:, :, None]  # (B, N, 1), matches the PyTorch output
    return past_lengths, out_emb, valid_mask


def init_pos_emb(key, max_sequence_len, embedding_dim):
    """Deterministic truncated-normal init, std = sqrt(1/embedding_dim)."""
    std = math.sqrt(1.0 / embedding_dim)
    w = jax.random.truncated_normal(
        key, -2.0, 2.0, (max_sequence_len, embedding_dim), dtype=jnp.float32
    )
    return w * std


def _run_and_check(key, B, N, D, max_sequence_len):
    k_pos, k_emb, k_ids, k_len = jax.random.split(key, 4)
    pos_emb_weight = init_pos_emb(k_pos, max_sequence_len, D)
    past_embeddings = jax.random.normal(k_emb, (B, N, D), dtype=jnp.float32)
    past_ids = jax.random.randint(k_ids, (B, N), minval=0, maxval=5, dtype=jnp.int32)
    past_lengths = jax.random.randint(k_len, (B,), minval=1, maxval=N + 1, dtype=jnp.int32)

    lengths_out, user_embeddings, valid_mask = learnable_pos_emb_preprocess(
        past_lengths, past_ids, past_embeddings, pos_emb_weight
    )
    jax.block_until_ready((lengths_out, user_embeddings, valid_mask))

    # Reference in plain JAX.
    ref_mask = (past_ids != 0).astype(jnp.float32)[:, :, None]
    ref = (past_embeddings * math.sqrt(D) + pos_emb_weight[:N][None, :, :]) * ref_mask
    assert jnp.allclose(user_embeddings, ref, atol=1e-5, rtol=1e-5)
    assert jnp.allclose(valid_mask, ref_mask)
    assert jnp.array_equal(lengths_out, past_lengths)


if __name__ == "__main__":
    key = jax.random.PRNGKey(0)
    k1, k2 = jax.random.split(key)

    # Small shape consistent with the module (single-block path).
    _run_and_check(k1, B=2, N=8, D=32, max_sequence_len=16)

    # Slightly larger shape to exercise the tiled grid / multi-block path.
    _run_and_check(k2, B=16, N=256, D=128, max_sequence_len=512)

    print("KERNEL_OK")
</pallas_src>

<mosaic_0001>
module attributes {stable_mosaic.version = 11 : i64} {
  func.func @_preproc_kernel(%arg0: i32, %arg1: i32, %arg2: memref<2x8xi32, #tpu.memory_space<vmem>>, %arg3: memref<2x8x32xf32, #tpu.memory_space<vmem>>, %arg4: memref<8x32xf32, #tpu.memory_space<vmem>>, %arg5: memref<2x8x32xf32, #tpu.memory_space<vmem>>, %arg6: memref<2x8xf32, #tpu.memory_space<vmem>>) attributes {dimension_semantics = [#tpu.dimension_semantics<parallel>, #tpu.dimension_semantics<parallel>], iteration_bounds = array<i64: 1, 1>, scalar_prefetch = 0 : i64, scratch_operands = 0 : i64, tpu.core_type = #tpu.core_type<tc>, window_params = [{transform_indices = @transform_0, window_bounds = array<i64: 2, 8>}, {transform_indices = @transform_1, window_bounds = array<i64: 2, 8, 32>}, {transform_indices = @transform_2, window_bounds = array<i64: 8, 32>}, {transform_indices = @transform_3, window_bounds = array<i64: 2, 8, 32>}, {transform_indices = @transform_4, window_bounds = array<i64: 2, 8>}]} {
    %c0 = arith.constant 0 : index
    %c0_0 = arith.constant 0 : index
    %0 = vector.load %arg2[%c0, %c0_0] : memref<2x8xi32, #tpu.memory_space<vmem>>, vector<2x8xi32>
    %c0_i32 = arith.constant 0 : i32
    %1 = vector.broadcast %c0_i32 : i32 to vector<2x8xi32>
    %2 = arith.cmpi ne, %0, %1 : vector<2x8xi32>
    %3 = arith.extui %2 : vector<2x8xi1> to vector<2x8xi32>
    %4 = arith.sitofp %3 : vector<2x8xi32> to vector<2x8xf32>
    %c0_1 = arith.constant 0 : index
    %c0_2 = arith.constant 0 : index
    %c0_3 = arith.constant 0 : index
    %5 = vector.load %arg3[%c0_1, %c0_2, %c0_3] : memref<2x8x32xf32, #tpu.memory_space<vmem>>, vector<2x8x32xf32>
    %cst = arith.constant 5.65685415 : f32
    %6 = vector.broadcast %cst : f32 to vector<2x8x32xf32>
    %7 = arith.mulf %5, %6 : vector<2x8x32xf32>
    %c0_4 = arith.constant 0 : index
    %c0_5 = arith.constant 0 : index
    %8 = vector.load %arg4[%c0_4, %c0_5] : memref<8x32xf32, #tpu.memory_space<vmem>>, vector<8x32xf32>
    %9 = vector.shape_cast %8 : vector<8x32xf32> to vector<1x8x32xf32>
    %10 = vector.broadcast %9 : vector<1x8x32xf32> to vector<2x8x32xf32>
    %11 = arith.addf %7, %10 : vector<2x8x32xf32>
    %12 = vector.shape_cast %4 : vector<2x8xf32> to vector<2x8x1xf32>
    %13 = vector.broadcast %12 : vector<2x8x1xf32> to vector<2x8x32xf32>
    %14 = arith.mulf %11, %13 : vector<2x8x32xf32>
    %c0_6 = arith.constant 0 : index
    %c0_7 = arith.constant 0 : index
    %c0_8 = arith.constant 0 : index
    %15 = vector.load %arg5[%c0_6, %c0_7, %c0_8] : memref<2x8x32xf32, #tpu.memory_space<vmem>>, vector<2x8x32xf32>
    tpu.vector_store %arg5[%c0_6, %c0_7, %c0_8], %14 {strides = array<i32>} : memref<2x8x32xf32, #tpu.memory_space<vmem>>, vector<2x8x32xf32>,
    %c0_9 = arith.constant 0 : index
    %c0_10 = arith.constant 0 : index
    %16 = vector.load %arg6[%c0_9, %c0_10] : memref<2x8xf32, #tpu.memory_space<vmem>>, vector<2x8xf32>
    tpu.vector_store %arg6[%c0_9, %c0_10], %4 {strides = array<i32>} : memref<2x8xf32, #tpu.memory_space<vmem>>, vector<2x8xf32>,
    return
  }
  func.func @transform_0(%arg0: i32, %arg1: i32) -> (i32, i32) {
    %c0_i32 = arith.constant 0 : i32
    return %arg1, %arg0 : i32, i32
  }
  func.func @transform_1(%arg0: i32, %arg1: i32) -> (i32, i32, i32) {
    %c0_i32 = arith.constant 0 : i32
    %c0_i32_0 = arith.constant 0 : i32
    return %arg1, %arg0, %c0_i32 : i32, i32, i32
  }
  func.func @transform_2(%arg0: i32, %arg1: i32) -> (i32, i32) {
    %c0_i32 = arith.constant 0 : i32
    %c0_i32_0 = arith.constant 0 : i32
    return %arg0, %c0_i32 : i32, i32
  }
  func.func @transform_3(%arg0: i32, %arg1: i32) -> (i32, i32, i32) {
    %c0_i32 = arith.constant 0 : i32
    %c0_i32_0 = arith.constant 0 : i32
    return %arg1, %arg0, %c0_i32 : i32, i32, i32
  }
  func.func @transform_4(%arg0: i32, %arg1: i32) -> (i32, i32) {
    %c0_i32 = arith.constant 0 : i32
    return %arg1, %arg0 : i32, i32
  }
}

</mosaic_0001>

<bundles_post_ra>
// kernel: tpu_custom_call.1
= control target key start
LH: loop header
LB: loop body
LE: loop exit
PB: predicated region body
PF: predicated region fallthrough
CT: control target
= control target key end

     0   :  { %10 = vsyncpa [#allocation3], 0  ;;  %s345_s0 = inlined_call_operand.hbm [shape: s32[2,8], index: 0, kind: input, shape index: {}]   ;;  %s346_s1 = inlined_call_operand.hbm [shape: f32[2,8,32], index: 1, kind: input, shape index: {}]   ;;  %s347_s2 = inlined_call_operand.hbm [shape: f32[8,32], index: 2, kind: input, shape index: {}]   ;;  %s348_s3 = inlined_call_operand.hbm [shape: f32[2,8,32], index: 3, kind: output, shape index: {0}]   ;;  %s349_s4 = inlined_call_operand.hbm [shape: f32[2,8], index: 4, kind: output, shape index: {1}]  }
   0x1   :  { %11 = vsyncpa [#allocation6], 0 }
   0x2   :  { %12 = vsyncpa [#allocation4], 0 }
   0x3   :  { %13 = vsyncpa [#allocation10], 0  ;;  %s246_s15 = smov [#allocation5]   ;;  %s128_s19 = scalar_lea.hbm %s346_s1, 256 }
   0x4   :  { %s29_s16 = sshll.u32 %s246_s15, 4  ;;  %p129_p0 = scmp.ne.s32.totalorder %s346_s1, %s128_s19  ;;  %s30_s16 = int_to_ptr.vmem [resolvable:$true] %s29_s16 }
   0x5   :  { %p132_p1 = scmp.lt.u32.totalorder %s128_s19, %s346_s1 }
   0x7   :  { %p134_p2 = pnand %p132_p1, %p129_p0 }
   0x9   :  { %137 = shalt.err (!%p134_p2)
}
   0xa   :  { %s138_s24 = scalar_lea.vmem %s30_s16, 256  ;;  %p143_p4 = scmp.lt.s32.totalorder %s30_s16, %s30_s16 }
   0xb   :  { %p139_p3 = scmp.ne.s32.totalorder %s30_s16, %s138_s24  ;;  %p144_p5 = scmp.lt.s32.totalorder %s138_s24, %s138_s24 }
   0xd   :  { %p145_p6 = por %p144_p5, %p143_p4 }
   0xf   :  { %p146_p7 = pnand %p145_p6, %p139_p3 }
  0x11   :  { %149 = shalt.err (!%p146_p7)
}
  0x12   :  { %s247_s25 = smov 128   ;;  %s248_s26 = smov 8  }
  0x13   :  { %35 = dma.hbm_to_vmem [thread:$0]  %s346_s1, 256, %s30_s16, [#allocation6], %s247_s25, %s247_s25, %s248_s26  }
  0x14   :  { %s249_s29 = smov [#allocation2]   ;;  %s250_s5 = smov [#allocation7]  }
  0x15   :  { %s20_s30 = sshll.u32 %s249_s29, 4  ;;  %s42_s6 = sshll.u32 %s250_s5, 4  ;;  %s21_s30 = int_to_ptr.vmem [resolvable:$true] %s20_s30  ;;  %s43_s6 = int_to_ptr.vmem [resolvable:$true] %s42_s6 }
  0x16   :  { %s150_s9 = scalar_lea.hbm %s345_s0, 32 }
  0x17   :  { %p151_p8 = scmp.ne.s32.totalorder %s345_s0, %s150_s9  ;;  %p154_p9 = scmp.lt.u32.totalorder %s150_s9, %s345_s0 }
  0x19   :  { %p156_p10 = pnand %p154_p9, %p151_p8 }
  0x1b   :  { %159 = shalt.err (!%p156_p10)
}
  0x1c   :  { %s160_s1 = scalar_lea.vmem %s21_s30, 32  ;;  %p165_p12 = scmp.lt.s32.totalorder %s21_s30, %s21_s30 }
  0x1d   :  { %p161_p11 = scmp.ne.s32.totalorder %s21_s30, %s160_s1  ;;  %p166_p13 = scmp.lt.s32.totalorder %s160_s1, %s160_s1 }
  0x1f   :  { %p167_p0 = por %p166_p13, %p165_p12 }
  0x21   :  { %p168_p1 = pnand %p167_p0, %p161_p11 }
  0x23   :  { %171 = shalt.err (!%p168_p1)
}
  0x24   :  { %23 = dma.hbm_to_vmem [thread:$0]  %s345_s0, 32, %s21_s30, [#allocation3]  }
  0x25   :  { %s172_s18 = scalar_lea.hbm %s347_s2, 128 }
  0x26   :  { %p173_p2 = scmp.ne.s32.totalorder %s347_s2, %s172_s18  ;;  %p176_p3 = scmp.lt.u32.totalorder %s172_s18, %s347_s2 }
  0x28   :  { %p178_p4 = pnand %p176_p3, %p173_p2 }
  0x2a   :  { %181 = shalt.err (!%p178_p4)
}
  0x2b   :  { %s182_s23 = scalar_lea.vmem %s43_s6, 128  ;;  %p187_p6 = scmp.lt.s32.totalorder %s43_s6, %s43_s6 }
  0x2c   :  { %p183_p5 = scmp.ne.s32.totalorder %s43_s6, %s182_s23  ;;  %p188_p7 = scmp.lt.s32.totalorder %s182_s23, %s182_s23 }
  0x2e   :  { %p189_p8 = por %p188_p7, %p187_p6 }
  0x30   :  { %p190_p9 = pnand %p189_p8, %p183_p5 }
  0x32   :  { %193 = shalt.err (!%p190_p9)
}
  0x33   :  { %45 = dma.hbm_to_vmem [thread:$0]  %s347_s2, 128, %s43_s6, [#allocation6]  }
  0x34   :  { %238 = dma.done.wait [#allocation3], 32  }
  0x35   :  { %239 = vsyncadd [#allocation3], 4294967264 }
  0x36   :  { %240 = dma.done.wait [#allocation6], 384  }
  0x37   :  { %241 = vsyncadd [#allocation6], 4294966912  ;;  %v66_v0 = vlaneseq  ;;  %s251_s27 = smov [#allocation9]   ;;  %v55_v3 = vld [vmem:[#allocation2] sm:$0x3]  ;;  %vm85_vm0 = vcmask 58368  }
  0x38   :  { %s105_s28 = sshll.u32 %s251_s27, 4  ;;  %vm56_vm1 = vcmp.ne.s32.totalorder %v55_v3, 0  ;;  %v252_v5 = vmov 0.0   ;;  %s106_s28 = int_to_ptr.vmem [resolvable:$true] %s105_s28 }
  0x39   :  { %v67_v1 = vshrl.u32 %v66_v0, 7  ;;  %v119_v6 = vsel %vm56_vm1, 1.0, %v252_v5  ;;  %s194_s29 = scalar_lea.vmem %s106_s28, 32  ;;  %p199_p11 = scmp.lt.s32.totalorder %s106_s28, %s106_s28 }
  0x3a   :  { %86 = vst.msk [vmem:[#allocation9] sm:$0x3] %vm85_vm0, %v119_v6  ;;  %p195_p10 = scmp.ne.s32.totalorder %s106_s28, %s194_s29  ;;  %p200_p12 = scmp.lt.s32.totalorder %s194_s29, %s194_s29 }
  0x3b   :  { %v68_v2 = vsub.s32 0, %v67_v1  ;;  %v75_v4 = vsub.s32 1, %v67_v1 }
  0x3c   :  { %p201_p13 = por %p200_p12, %p199_p11 }
  0x3d   :  { %v69_v7 = vrot.slane %v119_v6, %v68_v2 }
  0x3e   :  { %p202_p0 = pnand %p201_p13, %p195_p10 }
  0x40   :  { %205 = shalt.err (!%p202_p0)
}
  0x41   :  { %s206_s5 = scalar_lea.hbm %s349_s4, 32 }
  0x42   :  { %p207_p1 = scmp.ne.s32.totalorder %s349_s4, %s206_s5  ;;  %p210_p2 = scmp.lt.u32.totalorder %s206_s5, %s349_s4 }
  0x44   :  { %p212_p3 = pnand %p210_p2, %p207_p1 }
  0x46   :  { %215 = shalt.err (!%p212_p3)
}
  0x47   :  { %108 = dma.vmem_to_hbm [thread:$0]  %s106_s28, 32, %s349_s4, [#allocation10]   ;;  %71 = vbcast.lane.b32.xlu0 %v69_v7, 256  ;;  %v76_v8 = vrot.slane %v119_v6, %v75_v4  ;;  %v59_v9 = vld [vmem:[#allocation5] sm:$0xff]  ;;  %v63_v11 = vld [vmem:[#allocation7] sm:$0xff]  ;;  %v60_v12 = vld [vmem:[#allocation5 + $0x8] sm:$0xff] }
  0x48   :  { %v61_v10 = vmul.f32 5.656854, %v59_v9  ;;  %v62_v14 = vmul.f32 5.656854, %v60_v12  ;;  %vm82_vm2 = vcmask 261120   ;;  %s253_s12 = smov [#allocation8]  }
  0x49   :  { %s92_s13 = sshll.u32 %s253_s12, 4  ;;  %s93_s13 = int_to_ptr.vmem [resolvable:$true] %s92_s13 }
  0x4a   :  { %v64_v13 = vadd.f32 %v63_v11, %v61_v10  ;;  %v65_v17 = vadd.f32 %v63_v11, %v62_v14  ;;  %s216_s4 = scalar_lea.vmem %s93_s13, 256  ;;  %p221_p5 = scmp.lt.s32.totalorder %s93_s13, %s93_s13 }
  0x4b   :  { %78 = vbcast.lane.b32.xlu0 %v76_v8, 256  ;;  %p217_p4 = scmp.ne.s32.totalorder %s93_s13, %s216_s4  ;;  %p222_p6 = scmp.lt.s32.totalorder %s216_s4, %s216_s4 }
  0x4d   :  { %p223_p7 = por %p222_p6, %p221_p5 }
  0x4f   :  { %p224_p8 = pnand %p223_p7, %p217_p4 }
  0xb9   :  { %v72_v15 = vpop.permute.xlu0 %71 }
  0xba   :  { %v80_v16 = vmul.f32 %v72_v15, %v64_v13 }
  0xbc   :  { %83 = vst.msk [vmem:[#allocation8] sm:$0xff] %vm82_vm2, %v80_v16 }
  0xbd   :  { %v79_v18 = vpop.permute.xlu0 %78 }
  0xbe   :  { %v81_v19 = vmul.f32 %v79_v18, %v65_v17 }
  0xc0   :  { %84 = vst.msk [vmem:[#allocation8 + $0x8] sm:$0xff] %vm82_vm2, %v81_v19 }
  0xc1   :  { %227 = shalt.err (!%p224_p8)
}
  0xc2   :  { %s228_s15 = scalar_lea.hbm %s348_s3, 256 }
  0xc3   :  { %p229_p9 = scmp.ne.s32.totalorder %s348_s3, %s228_s15  ;;  %p232_p10 = scmp.lt.u32.totalorder %s228_s15, %s348_s3 }
  0xc5   :  { %p234_p11 = pnand %p232_p10, %p229_p9 }
  0xc7   :  { %237 = shalt.err (!%p234_p11)
}
  0xc8   :  { %98 = dma.vmem_to_hbm [thread:$0]  %s93_s13, 256, %s348_s3, [#allocation4], %s247_s25, %s247_s25, %s248_s26  }
  0xc9   :  { %242 = dma.done.wait [#allocation4], 256  }
  0xca   :  { %243 = vsyncadd [#allocation4], 4294967040 }
  0xcb   :  { %244 = dma.done.wait [#allocation10], 32  }
  0xcc   :  { %245 = vsyncadd [#allocation10], 4294967264 }
  0xcd   :  { %115 = vsyncpa [#allocation3], 1 }
  0xce   :  { %116 = vsyncpa [#allocation6], 1 }
  0xcf   :  { %117 = vsyncpa [#allocation4], 1 }
  0xd0   :  { %118 = vsyncpa [#allocation10], 1 }

</bundles_post_ra>
